<compile_context>
chip_gen: v6e
topology: v6e:2x2x1
jax: 0.10.0
libtpu: 0.0.40
codegen_flags: <defaults>
</compile_context>

<pallas_src>
import math

import jax
import jax.numpy as jnp
from jax.experimental import pallas as pl
from jax.experimental.pallas import tpu as pltpu

QMIN = -128.0
QMAX = 127.0

_BLOCK_ELEMS = 512 * 1024          # ~2 MiB of f32 per block
_VMEM_BLOCK_BUDGET = 2 * 1024 * 1024
_RAGGED_BLOCK_LIMIT = 3 * 1024 * 1024


def _round_up(v, m):
    return ((v + m - 1) // m) * m


def _fake_quant_kernel(scale_ref, x_ref, o_ref):
    """scale_ref: (2,) f32 in SMEM -> [inv_scale, scale]."""
    inv_scale = scale_ref[0]
    scale = scale_ref[1]
    x = x_ref[...]
    if x.dtype != jnp.float32:
        x = x.astype(jnp.float32)   # fake-quant math in f32 (torch parity)
    q = jnp.clip(jnp.round(x * inv_scale), QMIN, QMAX)
    o_ref[...] = (q * scale).astype(o_ref.dtype)


def _launch(x_view, block, grid, index_map, scale_arr):
    return pl.pallas_call(
        _fake_quant_kernel,
        out_shape=jax.ShapeDtypeStruct(x_view.shape, x_view.dtype),
        grid=grid,
        in_specs=[
            pl.BlockSpec(memory_space=pltpu.MemorySpace.SMEM),   # (2,) scales
            pl.BlockSpec(block, index_map),
        ],
        out_specs=pl.BlockSpec(block, index_map),
        compiler_params=pltpu.CompilerParams(
            dimension_semantics=("parallel",),   # shard steps across v7x's 2 TCs
        ),
    )(scale_arr, x_view)


def quant_module_forward(x, scale=None):
    """Forward pass of QuantModule on a float tensor (any shape, e.g. NCHW)."""
    if scale is None:
        # QuantStub with no scale is an identity; skip the kernel entirely.
        return x

    total = x.size
    if total == 0:
        return x

    orig_shape = x.shape
    scale_arr = jnp.array([1.0 / scale, scale], dtype=jnp.float32)

    if total % 128 == 0:
        # ---------- lane-dense fast path: 2-D (rows, lane) view ----------
        if x.ndim >= 2 and x.shape[-1] % 128 == 0 and x.shape[-1] <= 4096:
            lane = x.shape[-1]             # collapse leading dims only
        else:
            lane = 128
            for cand in (2048, 1024, 512, 256):
                if total % cand == 0:
                    lane = cand
                    break
        rows = total // lane
        x2d = x.reshape(rows, lane)

        # ~2 MiB f32 per block; 2 in + 2 out double-buffers = ~8 MiB VMEM.
        max_rows = max(8, ((_BLOCK_ELEMS // lane) // 8) * 8)
        if rows <= 8:
            row_tile = rows                # full extent (always legal)
        else:
            # at least 2 grid steps so both v7x TensorCores get work
            half = max(8, (pl.cdiv(rows, 2) // 8) * 8)
            row_tile = min(max_rows, half)
        grid = (pl.cdiv(rows, row_tile),)  # partial last block handled by Pallas

        out2d = _launch(x2d, (row_tile, lane), grid, lambda i: (i, 0), scale_arr)
        return out2d.reshape(orig_shape)

    # ---------- ragged path (element count not a multiple of 128) ----------
    # Keep the native shape: tile only the leading dim, full extent on all
    # trailing dims (block dims equal to full array dims are always legal),
    # so there is no pad and no post-slice HBM round-trip.
    itemsize = x.dtype.itemsize
    x_view = x.reshape(1, total) if x.ndim == 1 else x
    shape = x_view.shape
    lead = shape[0]

    # VMEM footprint contributed by one leading index (last two dims pad to (8,128)).
    if x_view.ndim == 2:
        per_row = _round_up(shape[1], 128) * itemsize
    else:
        per_row = (math.prod(shape[1:-2]) * _round_up(shape[-2], 8)
                   * _round_up(shape[-1], 128) * itemsize)

    bt = max(1, min(lead, _VMEM_BLOCK_BUDGET // max(per_row, 1)))
    if x_view.ndim == 2 and bt < lead:
        bt = min(lead, max(8, (bt // 8) * 8))   # 2nd-to-last dim: mult of 8 or full

    if bt * per_row > _RAGGED_BLOCK_LIMIT:
        # TODO(synk): pathological ragged shapes (huge trailing extent that is
        # not a multiple of 128) would overflow VMEM with full-extent trailing
        # blocks; fall back to one fused XLA elementwise op (same HBM traffic).
        return (jnp.clip(jnp.round(x.astype(jnp.float32) * (1.0 / scale)),
                         QMIN, QMAX) * scale).astype(x.dtype)

    ndim = x_view.ndim
    block = (bt,) + shape[1:]
    grid = (pl.cdiv(lead, bt),)
    out = _launch(x_view, block, grid,
                  lambda i: (i,) + (0,) * (ndim - 1), scale_arr)
    return out.reshape(orig_shape)


def quant_module_reference(x, scale=None):
    """Pure-JAX reference (same inv_scale formulation as torch fake-quant)."""
    if scale is None:
        return x
    return jnp.clip(jnp.round(x * (1.0 / scale)), QMIN, QMAX) * scale


if __name__ == "__main__":
    scale = 1.0 / 64.0

    # Small NCHW input consistent with a conv-style pipeline entry point.
    x = jax.random.normal(jax.random.PRNGKey(0), (2, 4, 16, 16), dtype=jnp.float32)
    y = jax.block_until_ready(quant_module_forward(x, scale=scale))
    y_ref = quant_module_reference(x, scale=scale)
    assert y.shape == x.shape and y.dtype == x.dtype
    assert jnp.allclose(y, y_ref, atol=1e-6), "mismatch vs reference (NCHW)"

    # Larger image: exercises a multi-step grid (>=2 steps, partial last block).
    x_big = jax.random.normal(jax.random.PRNGKey(1), (2, 3, 56, 64), dtype=jnp.float32)
    y_big = jax.block_until_ready(quant_module_forward(x_big, scale=scale))
    assert jnp.allclose(y_big, quant_module_reference(x_big, scale=scale), atol=1e-6), \
        "mismatch vs reference (multi-step grid)"

    # Odd-sized input (element count not a multiple of 128): ragged path,
    # native shape, no pad / slice round-trips.
    x_odd = jax.random.normal(jax.random.PRNGKey(2), (3, 5, 7, 11), dtype=jnp.float32)
    y_odd = jax.block_until_ready(quant_module_forward(x_odd, scale=scale))
    assert jnp.allclose(y_odd, quant_module_reference(x_odd, scale=scale), atol=1e-6), \
        "mismatch vs reference (ragged)"

    # scale=None (identity) path: no kernel launch, returns input unchanged.
    y_id = jax.block_until_ready(quant_module_forward(x, scale=None))
    assert jnp.array_equal(y_id, x)

    print("KERNEL_OK")
</pallas_src>

<mosaic_0001>
module attributes {stable_mosaic.version = 11 : i64} {
  func.func @_fake_quant_kernel(%arg0: i32, %arg1: memref<2xf32, #tpu.memory_space<smem>>, %arg2: memref<1x2048xf32, #tpu.memory_space<vmem>>, %arg3: memref<1x2048xf32, #tpu.memory_space<vmem>>) attributes {dimension_semantics = [#tpu.dimension_semantics<parallel>], iteration_bounds = array<i64: 1>, scalar_prefetch = 0 : i64, scratch_operands = 0 : i64, tpu.core_type = #tpu.core_type<tc>, window_params = [{transform_indices = @transform_0, window_bounds = array<i64: 2>}, {transform_indices = @transform_1, window_bounds = array<i64: 1, 2048>}, {transform_indices = @transform_2, window_bounds = array<i64: 1, 2048>}]} {
    %c0 = arith.constant 0 : index
    %0 = memref.load %arg1[%c0] : memref<2xf32, #tpu.memory_space<smem>>
    %c1 = arith.constant 1 : index
    %1 = memref.load %arg1[%c1] : memref<2xf32, #tpu.memory_space<smem>>
    %c0_0 = arith.constant 0 : index
    %c0_1 = arith.constant 0 : index
    %2 = vector.load %arg2[%c0_0, %c0_1] : memref<1x2048xf32, #tpu.memory_space<vmem>>, vector<1x2048xf32>
    %3 = vector.broadcast %0 : f32 to vector<1x2048xf32>
    %4 = arith.mulf %2, %3 : vector<1x2048xf32>
    %5 = math.roundeven %4 : vector<1x2048xf32>
    %cst = arith.constant -1.280000e+02 : f32
    %cst_2 = arith.constant 1.270000e+02 : f32
    %6 = vector.broadcast %cst : f32 to vector<1x2048xf32>
    %7 = arith.maximumf %6, %5 : vector<1x2048xf32>
    %8 = vector.broadcast %cst_2 : f32 to vector<1x2048xf32>
    %9 = arith.minimumf %8, %7 : vector<1x2048xf32>
    %10 = vector.broadcast %1 : f32 to vector<1x2048xf32>
    %11 = arith.mulf %9, %10 : vector<1x2048xf32>
    %c0_3 = arith.constant 0 : index
    %c0_4 = arith.constant 0 : index
    %12 = vector.load %arg3[%c0_3, %c0_4] : memref<1x2048xf32, #tpu.memory_space<vmem>>, vector<1x2048xf32>
    tpu.vector_store %arg3[%c0_3, %c0_4], %11 {strides = array<i32>} : memref<1x2048xf32, #tpu.memory_space<vmem>>, vector<1x2048xf32>,
    return
  }
  func.func @transform_0(%arg0: i32) -> i32 {
    %c0_i32 = arith.constant 0 : i32
    %c0_i32_0 = arith.constant 0 : i32
    return %c0_i32 : i32
  }
  func.func @transform_1(%arg0: i32) -> (i32, i32) {
    %c0_i32 = arith.constant 0 : i32
    %c0_i32_0 = arith.constant 0 : i32
    return %arg0, %c0_i32 : i32, i32
  }
  func.func @transform_2(%arg0: i32) -> (i32, i32) {
    %c0_i32 = arith.constant 0 : i32
    %c0_i32_0 = arith.constant 0 : i32
    return %arg0, %c0_i32 : i32, i32
  }
}

</mosaic_0001>

<bundles_post_ra>
// kernel: tpu_custom_call.1
= control target key start
LH: loop header
LB: loop body
LE: loop exit
PB: predicated region body
PF: predicated region fallthrough
CT: control target
= control target key end

     0   :  { %7 = vsyncpa [#allocation5], 0  ;;  %s170_s0 = inlined_call_operand.hbm [shape: f32[2], index: 0, kind: input, shape index: {}]   ;;  %s171_s1 = inlined_call_operand.hbm [shape: f32[1,2048], index: 1, kind: input, shape index: {}]   ;;  %s172_s2 = inlined_call_operand.hbm [shape: f32[1,2048], index: 2, kind: output, shape index: {}]  }
   0x1   :  { %8 = vsyncpa [#allocation3], 0 }
   0x2   :  { %9 = vsyncpa [#allocation4], 0  ;;  %s143_s9 = smov [#allocation2]   ;;  %s144_s12 = smov [#allocation6]  }
   0x3   :  { %17 = dma.hbm_to_smem %s170_s0, 16, %s143_s9, [#allocation5]  }
   0x4   :  { %s24_s13 = sshll.u32 %s144_s12, 4  ;;  %s25_s13 = int_to_ptr.vmem [resolvable:$true] %s24_s13 }
   0x5   :  { %s105_s14 = scalar_lea.vmem %s25_s13, 256  ;;  %p110_p1 = scmp.lt.s32.totalorder %s25_s13, %s25_s13 }
   0x6   :  { %p106_p0 = scmp.ne.s32.totalorder %s25_s13, %s105_s14  ;;  %p111_p2 = scmp.lt.s32.totalorder %s105_s14, %s105_s14 }
   0x8   :  { %p112_p3 = por %p111_p2, %p110_p1 }
   0xa   :  { %p113_p4 = pnand %p112_p3, %p106_p0 }
   0xc   :  { %116 = shalt.err (!%p113_p4)
}
   0xd   :  { %27 = dma.hbm_to_vmem [thread:$0]  %s171_s1, 256, %s25_s13, [#allocation3]  }
   0xe   :  { %137 = dma.done.wait [#allocation5], 16  }
   0xf   :  { %138 = vsyncadd [#allocation5], 4294967280 }
  0x10   :  { %139 = dma.done.wait [#allocation3], 256  }
  0x11   :  { %140 = vsyncadd [#allocation3], 4294967040 }
  0x12   :  { %34 = sfence }
  0x13   :  { %s35_s0 = sld [smem:[#allocation2]]  ;;  %v37_v0 = vld [vmem:[#allocation6] sm:$0xff]  ;;  %v38_v1 = vld [vmem:[#allocation6 + $0x8] sm:$0xff]  ;;  %s145_s1 = smov [#allocation7]  }
  0x14   :  { %s69_s17 = sld [smem:[#allocation2 + $0x1]]  ;;  %s59_s18 = sshll.u32 %s145_s1, 4  ;;  %s60_s18 = int_to_ptr.vmem [resolvable:$true] %s59_s18 }
  0x15   :  { %s117_s19 = scalar_lea.vmem %s60_s18, 256  ;;  %p122_p6 = scmp.lt.s32.totalorder %s60_s18, %s60_s18 }
  0x16   :  { %p118_p5 = scmp.ne.s32.totalorder %s60_s18, %s117_s19  ;;  %p123_p7 = scmp.lt.s32.totalorder %s117_s19, %s117_s19 }
  0x18   :  { %p124_p8 = por %p123_p7, %p122_p6 }
  0x19   :  { %v39_v2 = vstv %s35_s0 }
  0x1a   :  { %v40_v3 = vmul.f32 %v39_v2, %v37_v0  ;;  %v41_v4 = vmul.f32 %v39_v2, %v38_v1  ;;  %v48_v20 = vstv %s69_s17  ;;  %p125_p9 = pnand %p124_p8, %p118_p5 }
  0x1c   :  { %v72_v5 = vcvt.f32.s32 %v40_v3  ;;  %v70_v6 = vand.u32 2147483647, %v40_v3  ;;  %v80_v7 = vcvt.f32.s32 %v41_v4  ;;  %v75_v9 = vand.u32 2147483648, %v40_v3 }
  0x1d   :  { %v78_v10 = vand.u32 2147483647, %v41_v4  ;;  %v83_v12 = vand.u32 2147483648, %v41_v4 }
  0x1e   :  { %v73_v8 = vcvt.s32.f32 %v72_v5  ;;  %v81_v11 = vcvt.s32.f32 %v80_v7  ;;  %vm71_vm0 = vcmp.lt.f32.partialorder %v70_v6, 8388608.0 }
  0x1f   :  { %vm79_vm1 = vcmp.lt.f32.partialorder %v78_v10, 8388608.0 }
  0x20   :  { %v74_v13 = vand.u32 2147483647, %v73_v8  ;;  %v82_v14 = vand.u32 2147483647, %v81_v11 }
  0x22   :  { %v76_v15 = vor.u32 %v75_v9, %v74_v13  ;;  %v84_v16 = vor.u32 %v83_v12, %v82_v14 }
  0x24   :  { %v77_v17 = vsel %vm71_vm0, %v76_v15, %v40_v3  ;;  %v85_v19 = vsel %vm79_vm1, %v84_v16, %v41_v4 }
  0x25   :  { %v44_v18 = vmax.f32 %v77_v17, -128.0  ;;  %v45_v21 = vmax.f32 %v85_v19, -128.0 }
  0x27   :  { %v46_v22 = vmin.f32 %v44_v18, 127.0  ;;  %v47_v23 = vmin.f32 %v45_v21, 127.0 }
  0x29   :  { %v49_v24 = vmul.f32 %v48_v20, %v46_v22  ;;  %v50_v25 = vmul.f32 %v48_v20, %v47_v23 }
  0x2b   :  { %51 = vst [vmem:[#allocation7] sm:$0xff] %v49_v24  ;;  %52 = vst [vmem:[#allocation7 + $0x8] sm:$0xff] %v50_v25 }
  0x2c   :  { %128 = shalt.err (!%p125_p9)
}
  0x2d   :  { %62 = dma.vmem_to_hbm [thread:$0]  %s60_s18, 256, %s172_s2, [#allocation4]  }
  0x2e   :  { %141 = dma.done.wait [#allocation4], 256  }
  0x2f   :  { %142 = vsyncadd [#allocation4], 4294967040 }
  0x30   :  { %66 = vsyncpa [#allocation3], 1 }
  0x31   :  { %67 = vsyncpa [#allocation4], 1 }
  0x32   :  { %68 = vsyncpa [#allocation5], 1 }

</bundles_post_ra>
